<compile_context>
chip_gen: v5e
topology: v5e:2x2
jax: 0.10.0
libtpu: 0.0.40
codegen_flags: <defaults>
</compile_context>

<pallas_src>
import functools

import jax
import jax.numpy as jnp
from jax.experimental import pallas as pl
from jax.experimental.pallas import tpu as pltpu

_LANE = 128          # TPU lane width
_MAX_TILE_B = 16384  # VMEM-safety clamp on the batch tile


def _round_up(a: int, m: int) -> int:
    return (a + m - 1) // m * m


def mlp_kernel(x_ref, w1_ref, b1_ref, w2_ref, b2_ref, w3r_ref, b3_ref, o_ref):
    x = x_ref[...]                                               # [TILE_B, 100] f32

    # hidden1 + ReLU   (MXU)
    h1 = jnp.dot(x, w1_ref[...], preferred_element_type=jnp.float32)
    h1 = jnp.maximum(h1 + b1_ref[...], 0.0)                      # [TILE_B, 50]
    # dropout1: identity (eval mode)

    # hidden2 + ReLU   (MXU)
    h2 = jnp.dot(h1, w2_ref[...], preferred_element_type=jnp.float32)
    h2 = jnp.maximum(h2 + b2_ref[...], 0.0)                      # [TILE_B, 10]
    # dropout2: identity (eval mode)

    # Output layer Linear(10, 1), fused with a column -> lane-dense relayout.
    # For each 128-row chunk of the tile we transpose [128, 10] -> [10, 128]
    # (small 2-D XLU transpose) and contract the 10 features with the weight
    # row, producing a lane-dense [1, 128] result that is stored as one row of
    # the (1, TILE_B//128, 128) output block.  This avoids a last-dim-1 output
    # (masked partial stores + 128x lane-padded VMEM block).
    n_chunks = o_ref.shape[1]                                    # TILE_B // 128
    w3_row = w3r_ref[...]                                        # [1, 10]
    b3 = b3_ref[...]                                             # [1, 1]
    for r in range(n_chunks):                                    # static unroll
        chunk = h2[r * _LANE:(r + 1) * _LANE, :]                 # [128, 10]
        row = jnp.dot(w3_row, chunk.T,
                      preferred_element_type=jnp.float32) + b3   # [1, 128]
        o_ref[0, r, :] = row[0, :].astype(o_ref.dtype)


@functools.partial(jax.jit, static_argnames=("tile_b",))
def multiple_linear_regression(x, params, tile_b: int = 8192):
    """x: [B, 100] float32.  params: dict of transposed weights & biases."""
    B, F = x.shape
    assert F == 100

    # ---- batch tile selection -------------------------------------------
    # Lane-dense output requires TILE_B to be a multiple of 128.  Use the
    # largest tile the caller allows (default 8192, clamp 16384 for VMEM),
    # but keep >= 2 grid steps when the batch is big enough so both v7x
    # TensorCores get work via the "parallel" batch axis.
    b128 = _round_up(B, _LANE)
    tile = min(_round_up(max(tile_b, _LANE), _LANE), _MAX_TILE_B)
    tile = min(tile, b128)
    if b128 >= 2 * _LANE:
        tile = min(tile, _round_up((b128 + 1) // 2, _LANE))
    TILE_B = tile

    B_pad = _round_up(B, TILE_B)
    if B_pad != B:
        x = jnp.pad(x, ((0, B_pad - B), (0, 0)))
    num_tiles = B_pad // TILE_B
    n_chunks = TILE_B // _LANE

    w1, b1 = params["w1"], params["b1"]          # [100, 50], [1, 50]
    w2, b2 = params["w2"], params["b2"]          # [50, 10],  [1, 10]
    w3, b3 = params["w3"], params["b3"]          # [10, 1],   [1, 1]
    w3_row = w3.reshape(1, 10)                   # row layout for the fused relayout

    # Weights/biases: constant index_map -> loaded once, resident across steps.
    const2d = lambda a: pl.BlockSpec(a.shape, lambda i: (0, 0))

    out = pl.pallas_call(
        mlp_kernel,
        out_shape=jax.ShapeDtypeStruct((num_tiles, n_chunks, _LANE), jnp.float32),
        grid=(num_tiles,),
        in_specs=[
            pl.BlockSpec((TILE_B, 100), lambda i: (i, 0)),   # x: streamed per tile
            const2d(w1), const2d(b1),
            const2d(w2), const2d(b2),
            const2d(w3_row), const2d(b3),
        ],
        # Lane-dense output slab: block == full (n_chunks, 128) trailing dims.
        out_specs=pl.BlockSpec((1, n_chunks, _LANE), lambda i: (i, 0, 0)),
        compiler_params=pltpu.CompilerParams(
            dimension_semantics=("parallel",),
            vmem_limit_bytes=64 * 1024 * 1024,
        ),
    )(x, w1, b1, w2, b2, w3_row, b3)

    # (num_tiles, n_chunks, 128) row-major == batch order; un-flatten + crop.
    return out.reshape(B_pad, 1)[:B]


def init_params(key):
    """Deterministic init mimicking nn.Linear's uniform(-1/sqrt(in), 1/sqrt(in)).
    Weights are stored transposed: [in_features, out_features]."""
    def linear(key, fan_in, fan_out):
        kw, kb = jax.random.split(key)
        bound = 1.0 / jnp.sqrt(fan_in)
        w = jax.random.uniform(kw, (fan_in, fan_out), jnp.float32, -bound, bound)
        b = jax.random.uniform(kb, (1, fan_out), jnp.float32, -bound, bound)
        return w, b

    k1, k2, k3 = jax.random.split(key, 3)
    w1, b1 = linear(k1, 100, 50)
    w2, b2 = linear(k2, 50, 10)
    w3, b3 = linear(k3, 10, 1)
    return {"w1": w1, "b1": b1, "w2": w2, "b2": b2, "w3": w3, "b3": b3}


def _reference(x, params):
    h1 = jnp.maximum(x @ params["w1"] + params["b1"], 0.0)
    h2 = jnp.maximum(h1 @ params["w2"] + params["b2"], 0.0)
    return h2 @ params["w3"] + params["b3"]


if __name__ == "__main__":
    key = jax.random.PRNGKey(0)
    kx, kx2, kp = jax.random.split(key, 3)
    params = init_params(kp)

    # Small single-tile check (B=8 -> one 128-row tile, 1 output chunk).
    B = 8
    x = jax.random.normal(kx, (B, 100), jnp.float32)
    y = multiple_linear_regression(x, params)
    jax.block_until_ready(y)
    y_ref = _reference(x, params)
    assert y.shape == (B, 1)
    assert jnp.allclose(y, y_ref, atol=1e-5, rtol=1e-5)

    # Multi-tile check (exercises batch grid + padding path, n_chunks == 1).
    B2 = 300
    x2 = jax.random.normal(kx2, (B2, 100), jnp.float32)
    y2 = multiple_linear_regression(x2, params, tile_b=128)
    jax.block_until_ready(y2)
    y2_ref = _reference(x2, params)
    assert y2.shape == (B2, 1)
    assert jnp.allclose(y2, y2_ref, atol=1e-5, rtol=1e-5)

    # Default-tile check (exercises multi-chunk lane-dense store loop).
    y3 = multiple_linear_regression(x2, params)
    jax.block_until_ready(y3)
    assert y3.shape == (B2, 1)
    assert jnp.allclose(y3, y2_ref, atol=1e-5, rtol=1e-5)

    print("KERNEL_OK")
</pallas_src>

<mosaic_0001>
module attributes {stable_mosaic.version = 11 : i64} {
  func.func @mlp_kernel(%arg0: i32, %arg1: memref<128x100xf32, #tpu.memory_space<vmem>>, %arg2: memref<100x50xf32, #tpu.memory_space<vmem>>, %arg3: memref<1x50xf32, #tpu.memory_space<vmem>>, %arg4: memref<50x10xf32, #tpu.memory_space<vmem>>, %arg5: memref<1x10xf32, #tpu.memory_space<vmem>>, %arg6: memref<1x10xf32, #tpu.memory_space<vmem>>, %arg7: memref<1x1xf32, #tpu.memory_space<vmem>>, %arg8: memref<1x1x128xf32, #tpu.memory_space<vmem>>) attributes {dimension_semantics = [#tpu.dimension_semantics<parallel>], iteration_bounds = array<i64: 1>, scalar_prefetch = 0 : i64, scratch_operands = 0 : i64, tpu.core_type = #tpu.core_type<tc>, window_params = [{transform_indices = @transform_0, window_bounds = array<i64: 128, 100>}, {pipeline_mode = #tpu.pipeline_mode<synchronous>, transform_indices = @transform_1, window_bounds = array<i64: 100, 50>}, {pipeline_mode = #tpu.pipeline_mode<synchronous>, transform_indices = @transform_2, window_bounds = array<i64: 1, 50>}, {pipeline_mode = #tpu.pipeline_mode<synchronous>, transform_indices = @transform_3, window_bounds = array<i64: 50, 10>}, {pipeline_mode = #tpu.pipeline_mode<synchronous>, transform_indices = @transform_4, window_bounds = array<i64: 1, 10>}, {pipeline_mode = #tpu.pipeline_mode<synchronous>, transform_indices = @transform_5, window_bounds = array<i64: 1, 10>}, {pipeline_mode = #tpu.pipeline_mode<synchronous>, transform_indices = @transform_6, window_bounds = array<i64: 1, 1>}, {transform_indices = @transform_7, window_bounds = array<i64: 1, 1, 128>}]} {
    %c0 = arith.constant 0 : index
    %c0_0 = arith.constant 0 : index
    %0 = vector.load %arg1[%c0, %c0_0] : memref<128x100xf32, #tpu.memory_space<vmem>>, vector<128x100xf32>
    %c0_1 = arith.constant 0 : index
    %c0_2 = arith.constant 0 : index
    %1 = vector.load %arg2[%c0_1, %c0_2] : memref<100x50xf32, #tpu.memory_space<vmem>>, vector<100x50xf32>
    %cst = arith.constant dense<0.000000e+00> : vector<128x50xf32>
    %2 = tpu.matmul %0, %1, %cst {dimension_numbers = #tpu.dot_dimension_numbers<[1], [0], [0], [1], [0, 0, 1, 1], [], []>} : vector<128x100xf32>, vector<100x50xf32>, vector<128x50xf32> -> vector<128x50xf32>
    %c0_3 = arith.constant 0 : index
    %c0_4 = arith.constant 0 : index
    %3 = vector.load %arg3[%c0_3, %c0_4] : memref<1x50xf32, #tpu.memory_space<vmem>>, vector<1x50xf32>
    %4 = vector.broadcast %3 : vector<1x50xf32> to vector<128x50xf32>
    %5 = arith.addf %2, %4 : vector<128x50xf32>
    %cst_5 = arith.constant 0.000000e+00 : f32
    %6 = vector.broadcast %cst_5 : f32 to vector<128x50xf32>
    %7 = arith.maximumf %5, %6 : vector<128x50xf32>
    %c0_6 = arith.constant 0 : index
    %c0_7 = arith.constant 0 : index
    %8 = vector.load %arg4[%c0_6, %c0_7] : memref<50x10xf32, #tpu.memory_space<vmem>>, vector<50x10xf32>
    %cst_8 = arith.constant dense<0.000000e+00> : vector<128x10xf32>
    %9 = tpu.matmul %7, %8, %cst_8 {dimension_numbers = #tpu.dot_dimension_numbers<[1], [0], [0], [1], [0, 0, 1, 1], [], []>} : vector<128x50xf32>, vector<50x10xf32>, vector<128x10xf32> -> vector<128x10xf32>
    %c0_9 = arith.constant 0 : index
    %c0_10 = arith.constant 0 : index
    %10 = vector.load %arg5[%c0_9, %c0_10] : memref<1x10xf32, #tpu.memory_space<vmem>>, vector<1x10xf32>
    %11 = vector.broadcast %10 : vector<1x10xf32> to vector<128x10xf32>
    %12 = arith.addf %9, %11 : vector<128x10xf32>
    %cst_11 = arith.constant 0.000000e+00 : f32
    %13 = vector.broadcast %cst_11 : f32 to vector<128x10xf32>
    %14 = arith.maximumf %12, %13 : vector<128x10xf32>
    %c0_12 = arith.constant 0 : index
    %c0_13 = arith.constant 0 : index
    %15 = vector.load %arg6[%c0_12, %c0_13] : memref<1x10xf32, #tpu.memory_space<vmem>>, vector<1x10xf32>
    %c0_14 = arith.constant 0 : index
    %c0_15 = arith.constant 0 : index
    %16 = vector.load %arg7[%c0_14, %c0_15] : memref<1x1xf32, #tpu.memory_space<vmem>>, vector<1x1xf32>
    %17 = tpu.transpose %14, [1, 0] : vector<128x10xf32> -> vector<10x128xf32>
    %cst_16 = arith.constant dense<0.000000e+00> : vector<1x128xf32>
    %18 = tpu.matmul %15, %17, %cst_16 {dimension_numbers = #tpu.dot_dimension_numbers<[1], [0], [0], [1], [0, 0, 1, 1], [], []>} : vector<1x10xf32>, vector<10x128xf32>, vector<1x128xf32> -> vector<1x128xf32>
    %19 = vector.broadcast %16 : vector<1x1xf32> to vector<1x128xf32>
    %20 = arith.addf %18, %19 : vector<1x128xf32>
    %21 = vector.shape_cast %20 : vector<1x128xf32> to vector<128xf32>
    %c0_17 = arith.constant 0 : index
    %c0_18 = arith.constant 0 : index
    %c0_19 = arith.constant 0 : index
    %22 = vector.load %arg8[%c0_17, %c0_18, %c0_19] : memref<1x1x128xf32, #tpu.memory_space<vmem>>, vector<1x1x128xf32>
    %23 = vector.shape_cast %22 : vector<1x1x128xf32> to vector<128xf32>
    %24 = vector.shape_cast %21 : vector<128xf32> to vector<1x1x128xf32>
    tpu.vector_store %arg8[%c0_17, %c0_18, %c0_19], %24 {strides = array<i32>} : memref<1x1x128xf32, #tpu.memory_space<vmem>>, vector<1x1x128xf32>,
    return
  }
  func.func @transform_0(%arg0: i32) -> (i32, i32) {
    %c0_i32 = arith.constant 0 : i32
    %c0_i32_0 = arith.constant 0 : i32
    return %arg0, %c0_i32 : i32, i32
  }
  func.func @transform_1(%arg0: i32) -> (i32, i32) {
    %c0_i32 = arith.constant 0 : i32
    %c0_i32_0 = arith.constant 0 : i32
    %c0_i32_1 = arith.constant 0 : i32
    return %c0_i32, %c0_i32_0 : i32, i32
  }
  func.func @transform_2(%arg0: i32) -> (i32, i32) {
    %c0_i32 = arith.constant 0 : i32
    %c0_i32_0 = arith.constant 0 : i32
    %c0_i32_1 = arith.constant 0 : i32
    return %c0_i32, %c0_i32_0 : i32, i32
  }
  func.func @transform_3(%arg0: i32) -> (i32, i32) {
    %c0_i32 = arith.constant 0 : i32
    %c0_i32_0 = arith.constant 0 : i32
    %c0_i32_1 = arith.constant 0 : i32
    return %c0_i32, %c0_i32_0 : i32, i32
  }
  func.func @transform_4(%arg0: i32) -> (i32, i32) {
    %c0_i32 = arith.constant 0 : i32
    %c0_i32_0 = arith.constant 0 : i32
    %c0_i32_1 = arith.constant 0 : i32
    return %c0_i32, %c0_i32_0 : i32, i32
  }
  func.func @transform_5(%arg0: i32) -> (i32, i32) {
    %c0_i32 = arith.constant 0 : i32
    %c0_i32_0 = arith.constant 0 : i32
    %c0_i32_1 = arith.constant 0 : i32
    return %c0_i32, %c0_i32_0 : i32, i32
  }
  func.func @transform_6(%arg0: i32) -> (i32, i32) {
    %c0_i32 = arith.constant 0 : i32
    %c0_i32_0 = arith.constant 0 : i32
    %c0_i32_1 = arith.constant 0 : i32
    return %c0_i32, %c0_i32_0 : i32, i32
  }
  func.func @transform_7(%arg0: i32) -> (i32, i32, i32) {
    %c0_i32 = arith.constant 0 : i32
    %c0_i32_0 = arith.constant 0 : i32
    %c0_i32_1 = arith.constant 0 : i32
    return %arg0, %c0_i32, %c0_i32_0 : i32, i32, i32
  }
}

</mosaic_0001>

<bundles_post_ra>
// kernel: multiple_linear_regression.1
= control target key start
LH: loop header
LB: loop body
LE: loop exit
PB: predicated region body
PF: predicated region fallthrough
CT: control target
= control target key end

     0   :  { %vm110_vm0 = vcmask 1043456   ;;  %vm61_vm1 = vcmask 818176   ;;  %vm255_vm2 = vcmask 1041408   ;;  %vm206_vm3 = vcmask 408576   ;;  %s730_s1 = inlined_call_operand.vmem [shape: f32[100,50], index: 1, kind: input, shape index: {}]   ;;  %s731_s2 = inlined_call_operand.vmem [shape: f32[1,50], index: 2, kind: input, shape index: {}]   ;;  %s732_s0 = inlined_call_operand.vmem [shape: f32[128,100], index: 0, kind: input, shape index: {}]   ;;  %s733_s3 = inlined_call_operand.vmem [shape: f32[50,10], index: 3, kind: input, shape index: {}]   ;;  %s734_s4 = inlined_call_operand.vmem [shape: f32[1,10], index: 4, kind: input, shape index: {}]   ;;  %s735_s6 = inlined_call_operand.<no memory space> [shape: f32[1,1], index: 6, kind: input, shape index: {}]   ;;  %s736_s5 = inlined_call_operand.vmem [shape: f32[1,10], index: 5, kind: input, shape index: {}]   ;;  %s737_s7 = inlined_call_operand.vmem [shape: f32[1,1,128], index: 7, kind: output, shape index: {}]  }
   0x1   :  { %v56_v0 = vld [vmem:[%s730_s1 + $0x60] sm:$0xf]  ;;  %v55_v1 = vld [vmem:[%s730_s1 + $0x58] sm:$0xff]  ;;  %v54_v2 = vld [vmem:[%s730_s1 + $0x50] sm:$0xff]  ;;  %vm348_vm4 = vcmask 80896  }
   0x2   :  { %425 = vmatpush.msk.msra.mxu0 %vm110_vm0, %v56_v0  ;;  %476 = vmatpush.msk.msra.mxu3 %vm110_vm0, %v56_v0  ;;  %v53_v3 = vld [vmem:[%s730_s1 + $0x48] sm:$0xff]  ;;  %v52_v4 = vld [vmem:[%s730_s1 + $0x40] sm:$0xff]  ;;  %v51_v5 = vld [vmem:[%s730_s1 + $0x38] sm:$0xff] }
   0x3   :  { %v50_v6 = vld [vmem:[%s730_s1 + $0x30] sm:$0xff]  ;;  %v49_v7 = vld [vmem:[%s730_s1 + $0x28] sm:$0xff]  ;;  %v48_v8 = vld [vmem:[%s730_s1 + $0x20] sm:$0xff] }
   0x4   :  { %118 = vmatpush.msra.mxu0 %v55_v1  ;;  %477 = vmatpush.msra.mxu3 %v55_v1  ;;  %v47_v9 = vld [vmem:[%s730_s1 + $0x18] sm:$0xff]  ;;  %v46_v10 = vld [vmem:[%s730_s1 + $0x10] sm:$0xff]  ;;  %v45_v11 = vld [vmem:[%s730_s1 + $0x8] sm:$0xff] }
   0x5   :  { %v44_v12 = vld [vmem:[%s730_s1] sm:$0xff]  ;;  %v29_v14 = vld [vmem:[%s732_s0 + $0x8] sm:$0xff]  ;;  %v30_v15 = vld [vmem:[%s732_s0 + $0x10] sm:$0xff] }
   0x6   :  { %119 = vmatpush.msra.mxu0 %v54_v2  ;;  %478 = vmatpush.msra.mxu3 %v54_v2  ;;  %v28_v13 = vld [vmem:[%s732_s0] sm:$0xff]  ;;  %v31_v16 = vld [vmem:[%s732_s0 + $0x18] sm:$0xff]  ;;  %v37_v18 = vld [vmem:[%s732_s0 + $0x48] sm:$0xff] }
   0x7   :  { %v32_v17 = vld [vmem:[%s732_s0 + $0x20] sm:$0xff]  ;;  %v33_v19 = vld [vmem:[%s732_s0 + $0x28] sm:$0xff]  ;;  %v38_v20 = vld [vmem:[%s732_s0 + $0x50] sm:$0xff] }
   0x8   :  { %120 = vmatpush.msra.mxu0 %v53_v3  ;;  %479 = vmatpush.msra.mxu3 %v53_v3  ;;  %v34_v21 = vld [vmem:[%s732_s0 + $0x30] sm:$0xff]  ;;  %v39_v22 = vld [vmem:[%s732_s0 + $0x58] sm:$0xff]  ;;  %v200_v24 = vld [vmem:[%s733_s3 + $0x28] sm:$0xff] }
   0x9   :  { %v201_v23 = vld [vmem:[%s733_s3 + $0x30] sm:$0x3]  ;;  %v199_v25 = vld [vmem:[%s733_s3 + $0x20] sm:$0xff]  ;;  %v35_v26 = vld [vmem:[%s732_s0 + $0x38] sm:$0xff] }
   0xa   :  { %121 = vmatpush.msra.mxu0 %v52_v4  ;;  %480 = vmatpush.msra.mxu3 %v52_v4  ;;  %v198_v27 = vld [vmem:[%s733_s3 + $0x18] sm:$0xff]  ;;  %v40_v28 = vld [vmem:[%s732_s0 + $0x60] sm:$0xff]  ;;  %v41_v30 = vld [vmem:[%s732_s0 + $0x68] sm:$0xff] }
   0xb   :  { %442 = vmatpush.msk.msra.mxu1 %vm255_vm2, %v201_v23  ;;  %v36_v29 = vld [vmem:[%s732_s0 + $0x40] sm:$0xff]  ;;  %v42_v31 = vld [vmem:[%s732_s0 + $0x70] sm:$0xff]  ;;  %v43_v32 = vld [vmem:[%s732_s0 + $0x78] sm:$0xff] }
   0xc   :  { %122 = vmatpush.msra.mxu0 %v51_v5  ;;  %481 = vmatpush.msra.mxu3 %v51_v5  ;;  %v197_v33 = vld [vmem:[%s733_s3 + $0x10] sm:$0xff]  ;;  %v196_v34 = vld [vmem:[%s733_s3 + $0x8] sm:$0xff]  ;;  %v195_v35 = vld [vmem:[%s733_s3] sm:$0xff] }
   0xd   :  { %269 = vmatpush.msra.mxu1 %v200_v24  ;;  %v661_v36 = vld [vmem:[%s731_s2] ss:$0 sm:$0xff] }
   0xe   :  { %123 = vmatpush.msra.mxu0 %v50_v6  ;;  %482 = vmatpush.msra.mxu3 %v50_v6 }
   0xf   :  { %270 = vmatpush.msra.mxu1 %v199_v25 }
  0x10   :  { %124 = vmatpush.msra.mxu0 %v49_v7  ;;  %483 = vmatpush.msra.mxu3 %v49_v7 }
  0x11   :  { %271 = vmatpush.msra.mxu1 %v198_v27 }
  0x12   :  { %125 = vmatpush.msra.mxu0 %v48_v8  ;;  %484 = vmatpush.msra.mxu3 %v48_v8 }
  0x13   :  { %272 = vmatpush.msra.mxu1 %v197_v33 }
  0x14   :  { %126 = vmatpush.msra.mxu0 %v47_v9  ;;  %485 = vmatpush.msra.mxu3 %v47_v9 }
  0x15   :  { %273 = vmatpush.msra.mxu1 %v196_v34 }
  0x16   :  { %127 = vmatpush.msra.mxu0 %v46_v10  ;;  %486 = vmatpush.msra.mxu3 %v46_v10 }
  0x17   :  { %274 = vmatpush.msra.mxu1 %v195_v35 }
  0x18   :  { %128 = vmatpush.msra.mxu0 %v45_v11  ;;  %487 = vmatpush.msra.mxu3 %v45_v11 }
  0x1a   :  { %129 = vmatpush.msra.mxu0 %v44_v12  ;;  %488 = vmatpush.msra.mxu3 %v44_v12 }
  0x1b   :  { %426 = vmatmul.msk.f32.vlgmr.msra.gmra.mxu0 %vm61_vm1, %v28_v13  ;;  %435 = vmatmul.msk.f32.vlgmr.msra.gmra.mxu3 %vm61_vm1, %v37_v18 }
  0x23   :  { %427 = vmatmul.msk.f32.gmra.mxu0 %vm61_vm1, %v29_v14  ;;  %436 = vmatmul.msk.f32.gmra.mxu3 %vm61_vm1, %v38_v20 }
  0x2b   :  { %428 = vmatmul.msk.f32.gmra.mxu0 %vm61_vm1, %v30_v15  ;;  %437 = vmatmul.msk.f32.gmra.mxu3 %vm61_vm1, %v39_v22 }
  0x33   :  { %429 = vmatmul.msk.f32.gmra.mxu0 %vm61_vm1, %v31_v16  ;;  %438 = vmatmul.msk.f32.gmra.mxu3 %vm61_vm1, %v40_v28 }
  0x3b   :  { %430 = vmatmul.msk.f32.gmra.mxu0 %vm61_vm1, %v32_v17  ;;  %439 = vmatmul.msk.f32.gmra.mxu3 %vm61_vm1, %v41_v30 }
  0x43   :  { %431 = vmatmul.msk.f32.gmra.mxu0 %vm61_vm1, %v33_v19  ;;  %440 = vmatmul.msk.f32.gmra.mxu3 %vm61_vm1, %v42_v31 }
  0x4b   :  { %432 = vmatmul.msk.f32.gmra.mxu0 %vm61_vm1, %v34_v21  ;;  %441 = vmatmul.msk.f32.gmra.mxu3 %vm61_vm1, %v43_v32 }
  0x53   :  { %433 = vmatmul.msk.f32.gmra.mxu0 %vm61_vm1, %v35_v26 }
  0x5b   :  { %434 = vmatmul.msk.f32.gmra.mxu0 %vm61_vm1, %v36_v29 }
  0x98   :  { %v131_v37 = vpop.f32.mrf.mxu0 }
  0x99   :  { %v132_v38 = vadd.f32 %v661_v36, %v131_v37 }
  0x9b   :  { %v179_v39 = vmax.f32 %v132_v38, 0.0 }
  0x9d   :  { %443 = vmatmul.msk.f32.vlgmr.msra.gmra.mxu1 %vm206_vm3, %v179_v39 }
  0x9e   :  { %v158_v58 = vpop.f32.mrf.mxu3 }
  0x9f   :  { %v159_v2 = vadd.f32 %v661_v36, %v158_v58  ;;  %v493_v58 = vmov 0  }
  0xa0   :  { %v134_v40 = vpop.f32.mrf.mxu0  ;;  %490 = vset.pattern.permute.xlu0 %v493_v58 }
  0xa1   :  { %v135_v41 = vadd.f32 %v661_v36, %v134_v40  ;;  %v188_v3 = vmax.f32 %v159_v2, 0.0 }
  0xa3   :  { %v180_v42 = vmax.f32 %v135_v41, 0.0 }
  0xa5   :  { %444 = vmatmul.msk.f32.gmra.mxu1 %vm206_vm3, %v180_v42 }
  0xa6   :  { %v161_v63 = vpop.f32.mrf.mxu3 }
  0xa7   :  { %v162_v5 = vadd.f32 %v661_v36, %v161_v63 }
  0xa8   :  { %v137_v43 = vpop.f32.mrf.mxu0 }
  0xa9   :  { %v138_v44 = vadd.f32 %v661_v36, %v137_v43  ;;  %v189_v6 = vmax.f32 %v162_v5, 0.0 }
  0xab   :  { %v181_v45 = vmax.f32 %v138_v44, 0.0 }
  0xad   :  { %445 = vmatmul.msk.f32.gmra.mxu1 %vm206_vm3, %v181_v45 }
  0xae   :  { %v164_v4 = vpop.f32.mrf.mxu3 }
  0xaf   :  { %v165_v8 = vadd.f32 %v661_v36, %v164_v4 }
  0xb0   :  { %v140_v46 = vpop.f32.mrf.mxu0 }
  0xb1   :  { %v141_v47 = vadd.f32 %v661_v36, %v140_v46  ;;  %v190_v9 = vmax.f32 %v165_v8, 0.0 }
  0xb3   :  { %v182_v48 = vmax.f32 %v141_v47, 0.0 }
  0xb5   :  { %446 = vmatmul.msk.f32.gmra.mxu1 %vm206_vm3, %v182_v48 }
  0xb6   :  { %v167_v7 = vpop.f32.mrf.mxu3 }
  0xb7   :  { %v168_v10 = vadd.f32 %v661_v36, %v167_v7 }
  0xb8   :  { %v143_v49 = vpop.f32.mrf.mxu0 }
  0xb9   :  { %v144_v50 = vadd.f32 %v661_v36, %v143_v49  ;;  %v191_v12 = vmax.f32 %v168_v10, 0.0 }
  0xbb   :  { %v183_v51 = vmax.f32 %v144_v50, 0.0 }
  0xbd   :  { %447 = vmatmul.msk.f32.gmra.mxu1 %vm206_vm3, %v183_v51 }
  0xbe   :  { %v170_v11 = vpop.f32.mrf.mxu3 }
  0xbf   :  { %v171_v13 = vadd.f32 %v661_v36, %v170_v11 }
  0xc0   :  { %v146_v52 = vpop.f32.mrf.mxu0 }
  0xc1   :  { %v147_v53 = vadd.f32 %v661_v36, %v146_v52  ;;  %v192_v15 = vmax.f32 %v171_v13, 0.0 }
  0xc3   :  { %v184_v54 = vmax.f32 %v147_v53, 0.0 }
  0xc5   :  { %448 = vmatmul.msk.f32.gmra.mxu1 %vm206_vm3, %v184_v54 }
  0xc6   :  { %v173_v14 = vpop.f32.mrf.mxu3 }
  0xc7   :  { %v174_v16 = vadd.f32 %v661_v36, %v173_v14 }
  0xc8   :  { %v149_v55 = vpop.f32.mrf.mxu0 }
  0xc9   :  { %v150_v56 = vadd.f32 %v661_v36, %v149_v55  ;;  %v193_v17 = vmax.f32 %v174_v16, 0.0 }
  0xcb   :  { %v185_v57 = vmax.f32 %v150_v56, 0.0 }
  0xcd   :  { %449 = vmatmul.msk.f32.gmra.mxu1 %vm206_vm3, %v185_v57  ;;  %v12_v57 = vstv %s735_s6 }
  0xce   :  { %v176_v18 = vpop.f32.mrf.mxu3  ;;  %13 = vst [vmem:[#allocation2] sm:$0x1] %v12_v57 }
  0xcf   :  { %v177_v19 = vadd.f32 %v661_v36, %v176_v18 }
  0xd0   :  { %v152_v59 = vpop.f32.mrf.mxu0 }
  0xd1   :  { %v153_v60 = vadd.f32 %v661_v36, %v152_v59  ;;  %v194_v20 = vmax.f32 %v177_v19, 0.0 }
  0xd3   :  { %v186_v61 = vmax.f32 %v153_v60, 0.0 }
  0xd5   :  { %450 = vmatmul.msk.f32.gmra.mxu1 %vm206_vm3, %v186_v61  ;;  %v341_v63 = vld [vmem:[#allocation2] sm:$0x1] }
  0xd6   :  { %344 = vperm.xlu0 %490, %v341_v63  }
  0xd8   :  { %v155_v62 = vpop.f32.mrf.mxu0 }
  0xd9   :  { %v156_v0 = vadd.f32 %v661_v36, %v155_v62  ;;  %v492_v36 = vld [vmem:[%s734_s4] ss:$0 sm:$0xff] }
  0xdb   :  { %v187_v1 = vmax.f32 %v156_v0, 0.0 }
  0xdd   :  { %451 = vmatmul.msk.f32.gmra.mxu1 %vm206_vm3, %v187_v1 }
  0xe5   :  { %452 = vmatmul.msk.f32.gmra.mxu1 %vm206_vm3, %v188_v3 }
  0xed   :  { %453 = vmatmul.msk.f32.gmra.mxu1 %vm206_vm3, %v189_v6 }
  0xf5   :  { %454 = vmatmul.msk.f32.gmra.mxu1 %vm206_vm3, %v190_v9  ;;  %v340_v9 = vld [vmem:[%s736_s5] sm:$0x1] }
  0xfd   :  { %455 = vmatmul.msk.f32.gmra.mxu1 %vm206_vm3, %v191_v12 }
 0x105   :  { %456 = vmatmul.msk.f32.gmra.mxu1 %vm206_vm3, %v192_v15 }
 0x10d   :  { %457 = vmatmul.msk.f32.gmra.mxu1 %vm206_vm3, %v193_v17 }
 0x115   :  { %458 = vmatmul.msk.f32.gmra.mxu1 %vm206_vm3, %v194_v20 }
 0x11a   :  { %v695_v21 = vpop.f32.mrf.mxu1 }
 0x11b   :  { %v277_v6 = vadd.f32 %v492_v36, %v695_v21 }
 0x11d   :  { %v324_v8 = vmax.f32 %v277_v6, 0.0 }
 0x122   :  { %v697_v22 = vpop.f32.mrf.mxu1 }
 0x123   :  { %v280_v4 = vadd.f32 %v492_v36, %v697_v22 }
 0x125   :  { %v325_v7 = vmax.f32 %v280_v4, 0.0 }
 0x12a   :  { %v282_v23 = vpop.f32.mrf.mxu1 }
 0x12b   :  { %v283_v2 = vadd.f32 %v492_v36, %v282_v23 }
 0x12d   :  { %v326_v5 = vmax.f32 %v283_v2, 0.0 }
 0x132   :  { %v285_v24 = vpop.f32.mrf.mxu1 }
 0x133   :  { %v286_v0 = vadd.f32 %v492_v36, %v285_v24 }
 0x135   :  { %v327_v3 = vmax.f32 %v286_v0, 0.0 }
 0x13a   :  { %v288_v25 = vpop.f32.mrf.mxu1 }
 0x13b   :  { %v289_v61 = vadd.f32 %v492_v36, %v288_v25 }
 0x13d   :  { %v328_v1 = vmax.f32 %v289_v61, 0.0 }
 0x142   :  { %v291_v26 = vpop.f32.mrf.mxu1 }
 0x143   :  { %v292_v59 = vadd.f32 %v492_v36, %v291_v26 }
 0x145   :  { %v329_v62 = vmax.f32 %v292_v59, 0.0 }
 0x148   :  { %v345_v10 = vpop.permute.xlu0 %344 }
 0x149   :  { %v347_v11 = vperm.slane %v345_v10, 0 }
 0x14a   :  { %v294_v27 = vpop.f32.mrf.mxu1 }
 0x14b   :  { %v295_v55 = vadd.f32 %v492_v36, %v294_v27 }
 0x14d   :  { %v330_v60 = vmax.f32 %v295_v55, 0.0 }
 0x152   :  { %v297_v28 = vpop.f32.mrf.mxu1 }
 0x153   :  { %v298_v53 = vadd.f32 %v492_v36, %v297_v28 }
 0x155   :  { %v331_v56 = vmax.f32 %v298_v53, 0.0 }
 0x15a   :  { %v300_v29 = vpop.f32.mrf.mxu1 }
 0x15b   :  { %v301_v51 = vadd.f32 %v492_v36, %v300_v29 }
 0x15d   :  { %v332_v54 = vmax.f32 %v301_v51, 0.0 }
 0x162   :  { %v303_v30 = vpop.f32.mrf.mxu1 }
 0x163   :  { %v304_v49 = vadd.f32 %v492_v36, %v303_v30 }
 0x165   :  { %v333_v52 = vmax.f32 %v304_v49, 0.0 }
 0x16a   :  { %v306_v31 = vpop.f32.mrf.mxu1 }
 0x16b   :  { %v307_v47 = vadd.f32 %v492_v36, %v306_v31 }
 0x16d   :  { %v334_v50 = vmax.f32 %v307_v47, 0.0 }
 0x172   :  { %v309_v32 = vpop.f32.mrf.mxu1 }
 0x173   :  { %v310_v45 = vadd.f32 %v492_v36, %v309_v32 }
 0x175   :  { %v335_v48 = vmax.f32 %v310_v45, 0.0 }
 0x17a   :  { %v312_v33 = vpop.f32.mrf.mxu1 }
 0x17b   :  { %v313_v43 = vadd.f32 %v492_v36, %v312_v33 }
 0x17d   :  { %v336_v46 = vmax.f32 %v313_v43, 0.0 }
 0x182   :  { %v315_v34 = vpop.f32.mrf.mxu1 }
 0x183   :  { %v316_v41 = vadd.f32 %v492_v36, %v315_v34 }
 0x185   :  { %v337_v44 = vmax.f32 %v316_v41, 0.0 }
 0x18a   :  { %v318_v35 = vpop.f32.mrf.mxu1 }
 0x18b   :  { %v319_v39 = vadd.f32 %v492_v36, %v318_v35 }
 0x18d   :  { %v338_v42 = vmax.f32 %v319_v39, 0.0 }
 0x192   :  { %v321_v37 = vpop.f32.mrf.mxu1 }
 0x193   :  { %v322_v38 = vadd.f32 %v492_v36, %v321_v37 }
 0x195   :  { %v339_v40 = vmax.f32 %v322_v38, 0.0 }
 0x197   :  { %459 = vmatpush.xpose.msk.msra.mxu2 %vm348_vm4, %v339_v40 }
 0x19b   :  { %460 = vmatpush.xpose.msk.msra.mxu2 %vm348_vm4, %v338_v42 }
 0x19f   :  { %461 = vmatpush.xpose.msk.msra.mxu2 %vm348_vm4, %v337_v44 }
 0x1a3   :  { %462 = vmatpush.xpose.msk.msra.mxu2 %vm348_vm4, %v336_v46 }
 0x1a7   :  { %463 = vmatpush.xpose.msk.msra.mxu2 %vm348_vm4, %v335_v48 }
 0x1ab   :  { %464 = vmatpush.xpose.msk.msra.mxu2 %vm348_vm4, %v334_v50 }
 0x1af   :  { %465 = vmatpush.xpose.msk.msra.mxu2 %vm348_vm4, %v333_v52 }
 0x1b3   :  { %466 = vmatpush.xpose.msk.msra.mxu2 %vm348_vm4, %v332_v54 }
 0x1b7   :  { %467 = vmatpush.xpose.msk.msra.mxu2 %vm348_vm4, %v331_v56 }
 0x1bb   :  { %468 = vmatpush.xpose.msk.msra.mxu2 %vm348_vm4, %v330_v60 }
 0x1bf   :  { %469 = vmatpush.xpose.msk.msra.mxu2 %vm348_vm4, %v329_v62 }
 0x1c3   :  { %470 = vmatpush.xpose.msk.msra.mxu2 %vm348_vm4, %v328_v1 }
 0x1c7   :  { %471 = vmatpush.xpose.msk.msra.mxu2 %vm348_vm4, %v327_v3 }
 0x1cb   :  { %472 = vmatpush.xpose.msk.msra.mxu2 %vm348_vm4, %v326_v5 }
 0x1cf   :  { %473 = vmatpush.xpose.msk.msra.mxu2 %vm348_vm4, %v325_v7 }
 0x1d3   :  { %474 = vmatpush.xpose.msk.msra.mxu2 %vm348_vm4, %v324_v8 }
 0x1d6   :  { %475 = vmatmul.msk.f32.vlgmr.msra.gmra.mxu2 %vm348_vm4, %v340_v9 }
 0x259   :  { %v417_v12 = vpop.f32.mrf.mxu2 }
 0x25a   :  { %v418_v13 = vadd.f32 %v417_v12, %v347_v11 }
 0x25c   :  { %420 = vst [vmem:[%s737_s7] sm:$0x1] %v418_v13 }

</bundles_post_ra>
